<compile_context>
chip_gen: v7x
topology: tpu7x:2x2x1
jax: 0.10.0
libtpu: 0.0.40
codegen_flags: <defaults>
</compile_context>

<pallas_src>
import math
import functools

import jax
import jax.numpy as jnp
from jax.experimental import pallas as pl
from jax.experimental.pallas import tpu as pltpu


# ----------------------------- config ---------------------------------------
class MLAConfig:
    def __init__(self, dim=256, num_heads=4):
        self.dim = dim
        self.num_heads = num_heads
        self.per_head_dim = dim // num_heads
        self.dim_prime_compressed = self.per_head_dim * num_heads // 16
        self.dim_compressed = self.per_head_dim * num_heads // 16


# ----------------------------- kernel ----------------------------------------
def fused_mha_kernel(qk_ref, v_ref,
                     wqkT_ref, bqk_ref, wvT_ref, bv_ref, woT_ref, bo_ref,
                     o_ref, *, scale, num_heads):
    """One batch element per grid point: merged Q/K projection, V projection,
    attention, and the fused output projection in a single body."""
    H = num_heads
    qk = qk_ref[0]                     # (2H, S, 2*Dh) bf16  (heads 0..H-1 = q, H..2H-1 = k)
    v = v_ref[0]                       # (H, S, Dh)     bf16

    # Merged Q/K projection: one head-batched bf16 MXU matmul, f32 accumulate,
    # f32 bias add (biases shipped as (2H, Dh), broadcast over S).
    QK = jnp.einsum("hsf,hfd->hsd", qk, wqkT_ref[...],
                    preferred_element_type=jnp.float32) + bqk_ref[...][:, None, :]
    Q = QK[:H]                          # (H, S, Dh) f32
    K = QK[H:]                          # (H, S, Dh) f32

    V = jnp.einsum("hsf,hfd->hsd", v, wvT_ref[...],
                   preferred_element_type=jnp.float32) + bv_ref[...][:, None, :]

    # Scaled dot-product attention; scores / softmax stay in f32.
    s = jnp.einsum("hqd,hkd->hqk", Q.astype(jnp.bfloat16), K.astype(jnp.bfloat16),
                   preferred_element_type=jnp.float32) * scale          # (H, S, S)
    s = s - jnp.max(s, axis=-1, keepdims=True)
    p = jnp.exp(s)
    p = p * pl.reciprocal(jnp.sum(p, axis=-1, keepdims=True), approx=True)

    o = jnp.einsum("hqk,hkd->hqd", p.astype(jnp.bfloat16), V.astype(jnp.bfloat16),
                   preferred_element_type=jnp.float32)                   # (H, S, Dh) f32

    # Fused output projection as a single MXU-filling matmul:
    # lane-concat the heads -> (S, H*Dh = dim), then (S,dim) @ (dim,dim).
    o_cat = jnp.concatenate([o[h] for h in range(H)], axis=-1)           # (S, dim) f32
    u = jnp.dot(o_cat.astype(jnp.bfloat16), woT_ref[...],
                preferred_element_type=jnp.float32) + bo_ref[...]        # (S, dim) f32

    o_ref[0] = u.astype(o_ref.dtype)                                     # lane-dense store


# ----------------------------- parameter prep (once) --------------------------
def prepare_params(params):
    """Transpose / merge / bf16-cast weights once at parameter-init time."""
    H, Dh, two_dh = params["W_Q"].shape            # (H, Dh, 2*Dh)
    dim = params["W_O"].shape[0]

    wqT = jnp.transpose(params["W_Q"], (0, 2, 1))                     # (H, 2Dh, Dh)
    wkT = jnp.transpose(params["W_K"], (0, 2, 1))                     # (H, 2Dh, Dh)
    wqkT = jnp.concatenate([wqT, wkT], axis=0).astype(jnp.bfloat16)   # (2H, 2Dh, Dh)
    bqk = jnp.concatenate([params["b_Q"].reshape(H, Dh),
                           params["b_K"].reshape(H, Dh)], axis=0)     # (2H, Dh) f32
    wvT = jnp.transpose(params["W_V"], (0, 2, 1)).astype(jnp.bfloat16)  # (H, Dh, Dh)
    bv = params["b_V"].reshape(H, Dh)                                 # (H, Dh) f32
    woT = jnp.transpose(params["W_O"], (1, 0)).astype(jnp.bfloat16)   # (dim, dim)
    bo = params["b_O"].reshape(1, dim)                                # (1, dim) f32
    return {"wqkT": wqkT, "bqk": bqk, "wvT": wvT, "bv": bv, "woT": woT, "bo": bo}


# ----------------------------- forward (jitted) --------------------------------
@jax.jit
def multi_head_attention(q, k, v, prep):
    B, H, S, two_dh = q.shape
    Dh = two_dh // 2
    dim = prep["woT"].shape[1]
    scale = 1.0 / math.sqrt(two_dh)                # 1/sqrt(2*per_head_dim)

    # Stack q and k along the head axis (merged projection) and cast MXU operands to bf16.
    qk = jnp.concatenate([q, k], axis=1).astype(jnp.bfloat16)   # (B, 2H, S, 2Dh)
    vb = v.astype(jnp.bfloat16)                                  # (B, H, S, Dh)

    kernel = functools.partial(fused_mha_kernel, scale=scale, num_heads=H)
    out = pl.pallas_call(
        kernel,
        out_shape=jax.ShapeDtypeStruct((B, S, dim), jnp.float32),
        grid_spec=pltpu.PrefetchScalarGridSpec(
            num_scalar_prefetch=0,
            grid=(B,),
            in_specs=[
                pl.BlockSpec((1, 2 * H, S, two_dh), lambda b: (b, 0, 0, 0)),  # qk
                pl.BlockSpec((1, H, S, Dh),         lambda b: (b, 0, 0, 0)),  # v
                pl.BlockSpec((2 * H, two_dh, Dh),   lambda b: (0, 0, 0)),     # [W_Q^T; W_K^T] bf16
                pl.BlockSpec((2 * H, Dh),           lambda b: (0, 0)),        # [b_Q; b_K]
                pl.BlockSpec((H, Dh, Dh),           lambda b: (0, 0, 0)),     # W_V^T bf16
                pl.BlockSpec((H, Dh),               lambda b: (0, 0)),        # b_V
                pl.BlockSpec((dim, dim),            lambda b: (0, 0)),        # W_O^T bf16
                pl.BlockSpec((1, dim),              lambda b: (0, 0)),        # b_O
            ],
            out_specs=pl.BlockSpec((1, S, dim), lambda b: (b, 0, 0)),         # lane-dense [S, 256]
        ),
        compiler_params=pltpu.CompilerParams(
            dimension_semantics=("parallel",)),
    )(qk, vb, prep["wqkT"], prep["bqk"], prep["wvT"], prep["bv"],
      prep["woT"], prep["bo"])
    return out


# ----------------------------- reference (pure JAX, f32) -----------------------
def reference(q, k, v, params):
    Dh = params["W_Q"].shape[1]
    Q = jnp.einsum("bhsf,hdf->bhsd", q, params["W_Q"]) + params["b_Q"][None]
    K = jnp.einsum("bhsf,hdf->bhsd", k, params["W_K"]) + params["b_K"][None]
    V = jnp.einsum("bhsf,hdf->bhsd", v, params["W_V"]) + params["b_V"][None]
    s = jnp.einsum("bhqd,bhkd->bhqk", Q, K) / math.sqrt(2 * Dh)
    p = jax.nn.softmax(s, axis=-1)
    o = jnp.einsum("bhqk,bhkd->bhqd", p, V)
    B, H, S, D = o.shape
    o = jnp.transpose(o, (0, 2, 1, 3)).reshape(B, S, H * D)
    return jnp.einsum("bsd,ed->bse", o, params["W_O"]) + params["b_O"][0]


# ----------------------------- main -------------------------------------------
if __name__ == "__main__":
    config = MLAConfig(dim=256, num_heads=4)   # per_head_dim = 64
    B, S = 2, 8
    H, Dh, dim = config.num_heads, config.per_head_dim, config.dim

    key = jax.random.PRNGKey(0)
    ks = jax.random.split(key, 12)

    # Inputs (match PyTorch forward: q,k last dim = 2*per_head_dim, v last dim = per_head_dim)
    q = jax.random.normal(ks[0], (B, H, S, 2 * Dh), jnp.float32)
    k = jax.random.normal(ks[1], (B, H, S, 2 * Dh), jnp.float32)
    v = jax.random.normal(ks[2], (B, H, S, Dh), jnp.float32)

    # Deterministic parameter init (uniform +-1/sqrt(fan_in), like nn.Linear default)
    def uinit(key, shape, fan_in):
        bound = 1.0 / math.sqrt(fan_in)
        return jax.random.uniform(key, shape, jnp.float32, -bound, bound)

    params = {
        "W_Q": uinit(ks[3], (H, Dh, 2 * Dh), 2 * Dh),
        "b_Q": uinit(ks[4], (H, 1, Dh), 2 * Dh),
        "W_K": uinit(ks[5], (H, Dh, 2 * Dh), 2 * Dh),
        "b_K": uinit(ks[6], (H, 1, Dh), 2 * Dh),
        "W_V": uinit(ks[7], (H, Dh, Dh), Dh),
        "b_V": uinit(ks[8], (H, 1, Dh), Dh),
        "W_O": uinit(ks[9], (dim, dim), dim),
        "b_O": uinit(ks[10], (1, dim), dim),
    }

    prep = prepare_params(params)          # weight transpose / merge / bf16 cast: once
    out = multi_head_attention(q, k, v, prep)
    out = jax.block_until_ready(out)

    ref = reference(q, k, v, params)       # pure f32 reference of the module semantics
    assert out.shape == (B, S, dim), out.shape
    max_err = float(jnp.max(jnp.abs(out - ref)))
    # Tolerance loosened for the bf16 MXU-operand path (f32 accumulation, f32 softmax).
    assert jnp.allclose(out, ref, atol=4e-2, rtol=4e-2), max_err

    print("KERNEL_OK")
</pallas_src>

<mosaic_0001>
module attributes {stable_mosaic.version = 11 : i64} {
  func.func @fused_mha_kernel(%arg0: i32, %arg1: memref<1x8x8x128xbf16, #tpu.memory_space<vmem>>, %arg2: memref<1x4x8x64xbf16, #tpu.memory_space<vmem>>, %arg3: memref<8x128x64xbf16, #tpu.memory_space<vmem>>, %arg4: memref<8x64xf32, #tpu.memory_space<vmem>>, %arg5: memref<4x64x64xbf16, #tpu.memory_space<vmem>>, %arg6: memref<4x64xf32, #tpu.memory_space<vmem>>, %arg7: memref<256x256xbf16, #tpu.memory_space<vmem>>, %arg8: memref<1x256xf32, #tpu.memory_space<vmem>>, %arg9: memref<1x8x256xf32, #tpu.memory_space<vmem>>) attributes {dimension_semantics = [#tpu.dimension_semantics<parallel>], iteration_bounds = array<i64: 2>, scalar_prefetch = 0 : i64, scratch_operands = 0 : i64, tpu.core_type = #tpu.core_type<tc>, window_params = [{transform_indices = @transform_0, window_bounds = array<i64: 1, 8, 8, 128>}, {transform_indices = @transform_1, window_bounds = array<i64: 1, 4, 8, 64>}, {pipeline_mode = #tpu.pipeline_mode<synchronous>, transform_indices = @transform_2, window_bounds = array<i64: 8, 128, 64>}, {pipeline_mode = #tpu.pipeline_mode<synchronous>, transform_indices = @transform_3, window_bounds = array<i64: 8, 64>}, {pipeline_mode = #tpu.pipeline_mode<synchronous>, transform_indices = @transform_4, window_bounds = array<i64: 4, 64, 64>}, {pipeline_mode = #tpu.pipeline_mode<synchronous>, transform_indices = @transform_5, window_bounds = array<i64: 4, 64>}, {pipeline_mode = #tpu.pipeline_mode<synchronous>, transform_indices = @transform_6, window_bounds = array<i64: 256, 256>}, {pipeline_mode = #tpu.pipeline_mode<synchronous>, transform_indices = @transform_7, window_bounds = array<i64: 1, 256>}, {transform_indices = @transform_8, window_bounds = array<i64: 1, 8, 256>}]} {
    %c0 = arith.constant 0 : index
    %c0_0 = arith.constant 0 : index
    %c0_1 = arith.constant 0 : index
    %c0_2 = arith.constant 0 : index
    %0 = vector.load %arg1[%c0, %c0_0, %c0_1, %c0_2] : memref<1x8x8x128xbf16, #tpu.memory_space<vmem>>, vector<1x8x8x128xbf16>
    %1 = vector.shape_cast %0 : vector<1x8x8x128xbf16> to vector<8x8x128xbf16>
    %c0_3 = arith.constant 0 : index
    %c0_4 = arith.constant 0 : index
    %c0_5 = arith.constant 0 : index
    %c0_6 = arith.constant 0 : index
    %2 = vector.load %arg2[%c0_3, %c0_4, %c0_5, %c0_6] : memref<1x4x8x64xbf16, #tpu.memory_space<vmem>>, vector<1x4x8x64xbf16>
    %3 = vector.shape_cast %2 : vector<1x4x8x64xbf16> to vector<4x8x64xbf16>
    %c0_7 = arith.constant 0 : index
    %c0_8 = arith.constant 0 : index
    %c0_9 = arith.constant 0 : index
    %4 = vector.load %arg3[%c0_7, %c0_8, %c0_9] : memref<8x128x64xbf16, #tpu.memory_space<vmem>>, vector<8x128x64xbf16>
    "tpu.trace_start"() <{level = 10 : i32, message = "hsf,hfd->hsd"}> : () -> ()
    %cst = arith.constant dense<0.000000e+00> : vector<8x8x64xf32>
    %5 = tpu.matmul %1, %4, %cst {dimension_numbers = #tpu.dot_dimension_numbers<[2], [1], [1], [2], [0, 0, 0, 1, 1, 2], [0], [0]>} : vector<8x8x128xbf16>, vector<8x128x64xbf16>, vector<8x8x64xf32> -> vector<8x8x64xf32>
    "tpu.trace_stop"() : () -> ()
    %c0_10 = arith.constant 0 : index
    %c0_11 = arith.constant 0 : index
    %6 = vector.load %arg4[%c0_10, %c0_11] : memref<8x64xf32, #tpu.memory_space<vmem>>, vector<8x64xf32>
    %7 = vector.shape_cast %6 : vector<8x64xf32> to vector<8x1x64xf32>
    %8 = vector.broadcast %7 : vector<8x1x64xf32> to vector<8x8x64xf32>
    %9 = arith.addf %5, %8 : vector<8x8x64xf32>
    %10 = vector.extract_strided_slice %9 {offsets = [0, 0, 0], sizes = [4, 8, 64], strides = [1, 1, 1]} : vector<8x8x64xf32> to vector<4x8x64xf32>
    %11 = vector.extract_strided_slice %9 {offsets = [4, 0, 0], sizes = [4, 8, 64], strides = [1, 1, 1]} : vector<8x8x64xf32> to vector<4x8x64xf32>
    %c0_12 = arith.constant 0 : index
    %c0_13 = arith.constant 0 : index
    %c0_14 = arith.constant 0 : index
    %12 = vector.load %arg5[%c0_12, %c0_13, %c0_14] : memref<4x64x64xbf16, #tpu.memory_space<vmem>>, vector<4x64x64xbf16>
    "tpu.trace_start"() <{level = 10 : i32, message = "hsf,hfd->hsd"}> : () -> ()
    %cst_15 = arith.constant dense<0.000000e+00> : vector<4x8x64xf32>
    %13 = tpu.matmul %3, %12, %cst_15 {dimension_numbers = #tpu.dot_dimension_numbers<[2], [1], [1], [2], [0, 0, 0, 1, 1, 2], [0], [0]>} : vector<4x8x64xbf16>, vector<4x64x64xbf16>, vector<4x8x64xf32> -> vector<4x8x64xf32>
    "tpu.trace_stop"() : () -> ()
    %c0_16 = arith.constant 0 : index
    %c0_17 = arith.constant 0 : index
    %14 = vector.load %arg6[%c0_16, %c0_17] : memref<4x64xf32, #tpu.memory_space<vmem>>, vector<4x64xf32>
    %15 = vector.shape_cast %14 : vector<4x64xf32> to vector<4x1x64xf32>
    %16 = vector.broadcast %15 : vector<4x1x64xf32> to vector<4x8x64xf32>
    %17 = arith.addf %13, %16 : vector<4x8x64xf32>
    %18 = arith.truncf %10 : vector<4x8x64xf32> to vector<4x8x64xbf16>
    %19 = arith.truncf %11 : vector<4x8x64xf32> to vector<4x8x64xbf16>
    "tpu.trace_start"() <{level = 10 : i32, message = "hqd,hkd->hqk"}> : () -> ()
    %cst_18 = arith.constant dense<0.000000e+00> : vector<4x8x8xf32>
    %20 = tpu.matmul %18, %19, %cst_18 {dimension_numbers = #tpu.dot_dimension_numbers<[2], [2], [1], [1], [0, 0, 0, 1, 1, 1], [0], [0]>} : vector<4x8x64xbf16>, vector<4x8x64xbf16>, vector<4x8x8xf32> -> vector<4x8x8xf32>
    "tpu.trace_stop"() : () -> ()
    %cst_19 = arith.constant 0.0883883461 : f32
    %21 = vector.broadcast %cst_19 : f32 to vector<4x8x8xf32>
    %22 = arith.mulf %20, %21 : vector<4x8x8xf32>
    %cst_20 = arith.constant dense<0xFF800000> : vector<4x8xf32>
    %23 = vector.multi_reduction <maximumf>, %22, %cst_20 [2] : vector<4x8x8xf32> to vector<4x8xf32>
    %24 = vector.shape_cast %23 : vector<4x8xf32> to vector<4x8x1xf32>
    %25 = vector.broadcast %24 : vector<4x8x1xf32> to vector<4x8x8xf32>
    %26 = arith.subf %22, %25 : vector<4x8x8xf32>
    %27 = math.exp %26 : vector<4x8x8xf32>
    %cst_21 = arith.constant dense<0.000000e+00> : vector<4x8xf32>
    %28 = vector.multi_reduction <add>, %27, %cst_21 [2] : vector<4x8x8xf32> to vector<4x8xf32>
    %29 = vector.shape_cast %28 : vector<4x8xf32> to vector<4x8x1xf32>
    %30 = tpu.reciprocal %29 {approx = true} : vector<4x8x1xf32> -> vector<4x8x1xf32>
    %31 = vector.broadcast %30 : vector<4x8x1xf32> to vector<4x8x8xf32>
    %32 = arith.mulf %27, %31 : vector<4x8x8xf32>
    %33 = arith.truncf %32 : vector<4x8x8xf32> to vector<4x8x8xbf16>
    %34 = arith.truncf %17 : vector<4x8x64xf32> to vector<4x8x64xbf16>
    "tpu.trace_start"() <{level = 10 : i32, message = "hqk,hkd->hqd"}> : () -> ()
    %cst_22 = arith.constant dense<0.000000e+00> : vector<4x8x64xf32>
    %35 = tpu.matmul %33, %34, %cst_22 {dimension_numbers = #tpu.dot_dimension_numbers<[2], [1], [1], [2], [0, 0, 0, 1, 1, 2], [0], [0]>} : vector<4x8x8xbf16>, vector<4x8x64xbf16>, vector<4x8x64xf32> -> vector<4x8x64xf32>
    "tpu.trace_stop"() : () -> ()
    %36 = vector.extract_strided_slice %35 {offsets = [0, 0, 0], sizes = [1, 8, 64], strides = [1, 1, 1]} : vector<4x8x64xf32> to vector<1x8x64xf32>
    %37 = vector.shape_cast %36 : vector<1x8x64xf32> to vector<8x64xf32>
    %38 = vector.extract_strided_slice %35 {offsets = [1, 0, 0], sizes = [1, 8, 64], strides = [1, 1, 1]} : vector<4x8x64xf32> to vector<1x8x64xf32>
    %39 = vector.shape_cast %38 : vector<1x8x64xf32> to vector<8x64xf32>
    %40 = vector.extract_strided_slice %35 {offsets = [2, 0, 0], sizes = [1, 8, 64], strides = [1, 1, 1]} : vector<4x8x64xf32> to vector<1x8x64xf32>
    %41 = vector.shape_cast %40 : vector<1x8x64xf32> to vector<8x64xf32>
    %42 = vector.extract_strided_slice %35 {offsets = [3, 0, 0], sizes = [1, 8, 64], strides = [1, 1, 1]} : vector<4x8x64xf32> to vector<1x8x64xf32>
    %43 = vector.shape_cast %42 : vector<1x8x64xf32> to vector<8x64xf32>
    %44 = tpu.concatenate %37, %39, %41, %43 in 1 : vector<8x64xf32>, vector<8x64xf32>, vector<8x64xf32>, vector<8x64xf32> -> vector<8x256xf32>
    %45 = arith.truncf %44 : vector<8x256xf32> to vector<8x256xbf16>
    %c0_23 = arith.constant 0 : index
    %c0_24 = arith.constant 0 : index
    %46 = vector.load %arg7[%c0_23, %c0_24] : memref<256x256xbf16, #tpu.memory_space<vmem>>, vector<256x256xbf16>
    %cst_25 = arith.constant dense<0.000000e+00> : vector<8x256xf32>
    %47 = tpu.matmul %45, %46, %cst_25 {dimension_numbers = #tpu.dot_dimension_numbers<[1], [0], [0], [1], [0, 0, 1, 1], [], []>} : vector<8x256xbf16>, vector<256x256xbf16>, vector<8x256xf32> -> vector<8x256xf32>
    %c0_26 = arith.constant 0 : index
    %c0_27 = arith.constant 0 : index
    %48 = vector.load %arg8[%c0_26, %c0_27] : memref<1x256xf32, #tpu.memory_space<vmem>>, vector<1x256xf32>
    %49 = vector.broadcast %48 : vector<1x256xf32> to vector<8x256xf32>
    %50 = arith.addf %47, %49 : vector<8x256xf32>
    %c0_28 = arith.constant 0 : index
    %c0_29 = arith.constant 0 : index
    %c0_30 = arith.constant 0 : index
    %51 = vector.load %arg9[%c0_28, %c0_29, %c0_30] : memref<1x8x256xf32, #tpu.memory_space<vmem>>, vector<1x8x256xf32>
    %52 = vector.shape_cast %51 : vector<1x8x256xf32> to vector<8x256xf32>
    %53 = vector.shape_cast %50 : vector<8x256xf32> to vector<1x8x256xf32>
    tpu.vector_store %arg9[%c0_28, %c0_29, %c0_30], %53 {strides = array<i32>} : memref<1x8x256xf32, #tpu.memory_space<vmem>>, vector<1x8x256xf32>,
    return
  }
  func.func @transform_0(%arg0: i32) -> (i32, i32, i32, i32) {
    %c0_i32 = arith.constant 0 : i32
    %c0_i32_0 = arith.constant 0 : i32
    %c0_i32_1 = arith.constant 0 : i32
    %c0_i32_2 = arith.constant 0 : i32
    return %arg0, %c0_i32, %c0_i32_0, %c0_i32_1 : i32, i32, i32, i32
  }
  func.func @transform_1(%arg0: i32) -> (i32, i32, i32, i32) {
    %c0_i32 = arith.constant 0 : i32
    %c0_i32_0 = arith.constant 0 : i32
    %c0_i32_1 = arith.constant 0 : i32
    %c0_i32_2 = arith.constant 0 : i32
    return %arg0, %c0_i32, %c0_i32_0, %c0_i32_1 : i32, i32, i32, i32
  }
  func.func @transform_2(%arg0: i32) -> (i32, i32, i32) {
    %c0_i32 = arith.constant 0 : i32
    %c0_i32_0 = arith.constant 0 : i32
    %c0_i32_1 = arith.constant 0 : i32
    %c0_i32_2 = arith.constant 0 : i32
    return %c0_i32, %c0_i32_0, %c0_i32_1 : i32, i32, i32
  }
  func.func @transform_3(%arg0: i32) -> (i32, i32) {
    %c0_i32 = arith.constant 0 : i32
    %c0_i32_0 = arith.constant 0 : i32
    %c0_i32_1 = arith.constant 0 : i32
    return %c0_i32, %c0_i32_0 : i32, i32
  }
  func.func @transform_4(%arg0: i32) -> (i32, i32, i32) {
    %c0_i32 = arith.constant 0 : i32
    %c0_i32_0 = arith.constant 0 : i32
    %c0_i32_1 = arith.constant 0 : i32
    %c0_i32_2 = arith.constant 0 : i32
    return %c0_i32, %c0_i32_0, %c0_i32_1 : i32, i32, i32
  }
  func.func @transform_5(%arg0: i32) -> (i32, i32) {
    %c0_i32 = arith.constant 0 : i32
    %c0_i32_0 = arith.constant 0 : i32
    %c0_i32_1 = arith.constant 0 : i32
    return %c0_i32, %c0_i32_0 : i32, i32
  }
  func.func @transform_6(%arg0: i32) -> (i32, i32) {
    %c0_i32 = arith.constant 0 : i32
    %c0_i32_0 = arith.constant 0 : i32
    %c0_i32_1 = arith.constant 0 : i32
    return %c0_i32, %c0_i32_0 : i32, i32
  }
  func.func @transform_7(%arg0: i32) -> (i32, i32) {
    %c0_i32 = arith.constant 0 : i32
    %c0_i32_0 = arith.constant 0 : i32
    %c0_i32_1 = arith.constant 0 : i32
    return %c0_i32, %c0_i32_0 : i32, i32
  }
  func.func @transform_8(%arg0: i32) -> (i32, i32, i32) {
    %c0_i32 = arith.constant 0 : i32
    %c0_i32_0 = arith.constant 0 : i32
    %c0_i32_1 = arith.constant 0 : i32
    return %arg0, %c0_i32, %c0_i32_0 : i32, i32, i32
  }
}

</mosaic_0001>

<bundles_post_ra>
// kernel: multi_head_attention.1
= control target key start
LH: loop header
LB: loop body
LE: loop exit
PB: predicated region body
PF: predicated region fallthrough
CT: control target
= control target key end

     0   :  { %13 = vsyncpa [#allocation3], 0  ;;  %s3866_s0 = inlined_call_operand.vmem [shape: bf16[2,8,8,128], index: 0, kind: input, shape index: {}]   ;;  %s3867_s1 = inlined_call_operand.vmem [shape: bf16[2,4,8,64], index: 1, kind: input, shape index: {}]   ;;  %s3868_s2 = inlined_call_operand.vmem [shape: bf16[8,128,64], index: 2, kind: input, shape index: {}]   ;;  %s3869_s3 = inlined_call_operand.vmem [shape: f32[8,64], index: 3, kind: input, shape index: {}]   ;;  %s3870_s4 = inlined_call_operand.vmem [shape: bf16[4,64,64], index: 4, kind: input, shape index: {}]   ;;  %s3871_s5 = inlined_call_operand.vmem [shape: f32[4,64], index: 5, kind: input, shape index: {}]   ;;  %s3872_s6 = inlined_call_operand.vmem [shape: bf16[256,256], index: 6, kind: input, shape index: {}]   ;;  %s3873_s7 = inlined_call_operand.vmem [shape: f32[1,256], index: 7, kind: input, shape index: {}]   ;;  %s3874_s8 = inlined_call_operand.hbm [shape: f32[2,8,256], index: 8, kind: output, shape index: {}]  }
   0x1   :  { %15 = vsyncpa [#allocation3 + $0x1], 0  ;;  %s3199_s27 = smov 0   ;;  %s3201_s28 = smov 0  }
   0x2   :  { %s3203_s29 = smov 0   ;;  %s3205_s30 = smov 0  }
   0x3 LB: > { %s3220_s9 = sadd.s32 4294967295, %s3147_s30   ;;  %s2386_s10 = sadd.s32 4294967294, %s3147_s30   ;;  %s3147_s30 = sphi %s3205_s30, %s3880_s30   ;;  %s3143_s29 = sphi %s3203_s29, %s3879_s29   ;;  %s3139_s28 = sphi %s3201_s28, %s3878_s28   ;;  %s3135_s27 = sphi %s3199_s27, %s3877_s27  }
   0x4   : > { %s3224_s11 = sadd.s32 1, %s3147_s30   ;;  %s206_s12 = sadd.s32 1, %s3143_s29 }
   0x5   : > { %s203_s13 = ssub.s32 %s3147_s30, %s3224_s11  ;;  %p216_p0 = scmp.ne.s32.totalorder %s3143_s29, %s3139_s28 }
   0x6   : > { %p204_p1 = scmp.eq.s32.totalorder %s203_s13, 0  ;;  %p217_p2 = scmp.eq.s32.totalorder %s3220_s9, 1 }
   0x7   : > { %p222_p3 = scmp.ne.s32.totalorder %s3139_s28, %s3135_s27  ;;  %p223_p4 = scmp.eq.s32.totalorder %s2386_s10, 1 }
   0x8   : > { %s3235_s14 = scalar_select %p204_p1, %s3143_s29, %s206_s12  }
   0x9   : > { %p3237_p5 = por %p217_p2, %p216_p0  ;;  %p3241_p6 = por %p223_p4, %p222_p3 }
   0xa   : > { %p2389_p7 = scmp.ge.s32.totalorder %s3147_s30, 1  ;;  %p275_p8 = scmp.lt.s32.totalorder %s3147_s30, 3 }
   0xc   : > { %p276_p9 = pnand %p2389_p7, %p275_p8 }
   0xd   : > { %v2940_v0 = vld [vmem:[%s3868_s2] sm:$0xff] (!%p276_p9)   ;;  %v3149_v1 = vmov (!%p276_p9), 0.0   ;;  %v2942_v3 = vld [vmem:[%s3868_s2 + $0x8] sm:$0xff] (!%p276_p9)   ;;  %vm3150_vm0 = vmmov (!%p276_p9), 0   ;;  %v2944_v5 = vld [vmem:[%s3868_s2 + $0x10] sm:$0xff] (!%p276_p9)   ;;  %p314_p10 = scmp.lt.s32.totalorder (!%p276_p9), %s3220_s9, 1 }
   0xe   : > { %279 = sbr.rel (%p276_p9) target bundleno = 1492 (0x5d4), region = 52  ;;  %2636 = vmatprep.subr.bf16.mxu1 (!%p276_p9), %v3149_v1  ;;  %2676 = vmatprep.subr.bf16.mxu0 (!%p276_p9), %v3149_v1  ;;  %v2941_v2 = vld [vmem:[%s3868_s2 + $0x80] sm:$0xff] (!%p276_p9)   ;;  %v2943_v4 = vld [vmem:[%s3868_s2 + $0x88] sm:$0xff] (!%p276_p9)   ;;  %v2945_v6 = vld [vmem:[%s3868_s2 + $0x90] sm:$0xff] (!%p276_p9)   ;;  %vm1362_vm1 = vcmask (!%p276_p9), 523264   ;;  %vm1859_vm2 = vcmask (!%p276_p9), 1043456  }
   0xf   : > { %2637 = vmatpush3.bf16.msra.mxu1 (!%p276_p9), %v2940_v0  ;;  %2652 = vmatprep.mubr.msk.bf16.mxu1 (!%p276_p9), %vm3150_vm0, %v3149_v1  ;;  %v2946_v7 = vld [vmem:[%s3868_s2 + $0x18] sm:$0xff] (!%p276_p9)   ;;  %v2948_v9 = vld [vmem:[%s3868_s2 + $0x20] sm:$0xff] (!%p276_p9)   ;;  %v2950_v11 = vld [vmem:[%s3868_s2 + $0x28] sm:$0xff] (!%p276_p9)   ;;  %vm1803_vm3 = vcmask (!%p276_p9), 64512   ;;  %s3152_s12 = smov (!%p276_p9), 64   ;;  %s311_s13 = sand.u32 (!%p276_p9), 1, %s3139_s28  }
  0x10   : > { %2677 = vmatpush3.bf16.msra.mxu0 (!%p276_p9), %v2941_v2  ;;  %2638 = vmatprep.subr.bf16.mxu1 (!%p276_p9), %v3149_v1  ;;  %v2947_v8 = vld [vmem:[%s3868_s2 + $0x98] sm:$0xff] (!%p276_p9)   ;;  %v2949_v10 = vld [vmem:[%s3868_s2 + $0xa0] sm:$0xff] (!%p276_p9)   ;;  %v2951_v12 = vld [vmem:[%s3868_s2 + $0xa8] sm:$0xff] (!%p276_p9)   ;;  %s2390_s17 = sshll.u32 (!%p276_p9), %s311_s13, 4  ;;  %s2527_s20 = sshll.u32 (!%p276_p9), %s3220_s9, 8 }
  0x11   : > { %2678 = vmatprep.subr.bf16.mxu0 (!%p276_p9), %v3149_v1  ;;  %2692 = vmatprep.mubr.msk.bf16.mxu0 (!%p276_p9), %vm3150_vm0, %v3149_v1  ;;  %v2952_v13 = vld [vmem:[%s3868_s2 + $0x30] sm:$0xff] (!%p276_p9)   ;;  %v2954_v15 = vld [vmem:[%s3868_s2 + $0x38] sm:$0xff] (!%p276_p9)   ;;  %v2956_v18 = vld [vmem:[%s3868_s2 + $0x40] sm:$0xff] (!%p276_p9)  }
  0x12   : > { %v2953_v14 = vld [vmem:[%s3868_s2 + $0xb0] sm:$0xff] (!%p276_p9)   ;;  %v2955_v16 = vld [vmem:[%s3868_s2 + $0xb8] sm:$0xff] (!%p276_p9)   ;;  %v2957_v20 = vld [vmem:[%s3868_s2 + $0x100] sm:$0xff] (!%p276_p9)  }
  0x13   : > { %2639 = vmatpush3.bf16.msra.mxu1 (!%p276_p9), %v2942_v3  ;;  %v2958_v21 = vld [vmem:[%s3868_s2 + $0x48] sm:$0xff] (!%p276_p9)   ;;  %v2960_v23 = vld [vmem:[%s3868_s2 + $0x50] sm:$0xff] (!%p276_p9)   ;;  %v2962_v25 = vld [vmem:[%s3868_s2 + $0x58] sm:$0xff] (!%p276_p9)  }
  0x14   : > { %2679 = vmatpush3.bf16.msra.mxu0 (!%p276_p9), %v2943_v4  ;;  %2640 = vmatprep.subr.bf16.mxu1 (!%p276_p9), %v3149_v1  ;;  %v2959_v22 = vld [vmem:[%s3868_s2 + $0x108] sm:$0xff] (!%p276_p9)   ;;  %v2961_v24 = vld [vmem:[%s3868_s2 + $0x110] sm:$0xff] (!%p276_p9)   ;;  %v2963_v26 = vld [vmem:[%s3868_s2 + $0x118] sm:$0xff] (!%p276_p9)  }
  0x15   : > { %2680 = vmatprep.subr.bf16.mxu0 %v3149_v1  ;;  %s3296_s26 = scalar_select %p314_p10, %s3220_s9, 1  ;;  %v2964_v27 = vld [vmem:[%s3868_s2 + $0x60] sm:$0xff]   ;;  %v2966_v29 = vld [vmem:[%s3868_s2 + $0x68] sm:$0xff]   ;;  %v2968_v31 = vld [vmem:[%s3868_s2 + $0x70] sm:$0xff]  }
  0x16   : > { %v2965_v28 = vld [vmem:[%s3868_s2 + $0x120] sm:$0xff]   ;;  %v2967_v30 = vld [vmem:[%s3868_s2 + $0x128] sm:$0xff]   ;;  %v2969_v32 = vld [vmem:[%s3868_s2 + $0x130] sm:$0xff]   ;;  %s2301_s9 = scalar_lea.sflag [#allocation3], %s311_s13 }
  0x17   : > { %2641 = vmatpush3.bf16.msra.mxu1 %v2944_v5  ;;  %s2525_s18 = sshll.u32 %s3296_s26, 5  ;;  %v2970_v33 = vld [vmem:[%s3868_s2 + $0x78] sm:$0xff]   ;;  %v2972_v37 = vld [vmem:[%s3868_s2 + $0xc0] sm:$0xff]   ;;  %v2974_v39 = vld [vmem:[%s3868_s2 + $0xc8] sm:$0xff]   ;;  %s2526_s10 = sshll.u32 %s3296_s26, 4 }
  0x18   : > { %2681 = vmatpush3.bf16.msra.mxu0 %v2945_v6  ;;  %2642 = vmatprep.subr.bf16.mxu1 %v3149_v1  ;;  %s3315_s23 = scalar_lea.vmem %s3866_s0, %s2525_s18  ;;  %v2971_v34 = vld [vmem:[%s3868_s2 + $0x138] sm:$0xff]   ;;  %v2973_v38 = vld [vmem:[%s3868_s2 + $0x180] sm:$0xff]   ;;  %v2975_v40 = vld [vmem:[%s3868_s2 + $0x188] sm:$0xff]   ;;  %s3528_s21 = scalar_lea.vmem %s3867_s1, %s2526_s10 }
  0x19   : > { %2682 = vmatprep.subr.bf16.mxu0 %v3149_v1  ;;  %v325_v17 = vld [vmem:[%s3315_s23] sm:$0xf]  ;;  %v327_v19 = vld [vmem:[%s3315_s23 + $0x8] sm:$0xf]  ;;  %v326_v35 = vld [vmem:[%s3315_s23 + $0x4] sm:$0xf] }
  0x1a   : > { %v329_v36 = vld [vmem:[%s3315_s23 + $0x10] sm:$0xf]  ;;  %v2978_v43 = vld [vmem:[%s3868_s2 + $0xd8] sm:$0xff]   ;;  %v2980_v45 = vld [vmem:[%s3868_s2 + $0xe0] sm:$0xff]   ;;  %s313_s26 = scalar_lea.vmem [#allocation2], %s2390_s17  ;;  %s3153_s10 = smov [#allocation2]  }
  0x1b   : > { %2643 = vmatpush3.bf16.msra.mxu1 %v2946_v7  ;;  %v2976_v41 = vld [vmem:[%s3868_s2 + $0xd0] sm:$0xff]   ;;  %v2979_v44 = vld [vmem:[%s3868_s2 + $0x198] sm:$0xff]   ;;  %v2981_v46 = vld [vmem:[%s3868_s2 + $0x1a0] sm:$0xff]   ;;  %s2315_s22 = sshll.u32 %s313_s26, 4  ;;  %s3826_s22 = int_to_ptr.vmem [resolvable:$true] %s2315_s22 }
  0x1c   : > { %2683 = vmatpush3.bf16.msra.mxu0 %v2947_v8  ;;  %2644 = vmatprep.subr.bf16.mxu1 %v3149_v1  ;;  %v2977_v42 = vld [vmem:[%s3868_s2 + $0x190] sm:$0xff]   ;;  %v2982_v47 = vld [vmem:[%s3868_s2 + $0xe8] sm:$0xff]   ;;  %v2986_v51 = vld [vmem:[%s3868_s2 + $0xf8] sm:$0xff]  }
  0x1d   : > { %2684 = vmatprep.subr.bf16.mxu0 %v3149_v1  ;;  %v2983_v48 = vld [vmem:[%s3868_s2 + $0x1a8] sm:$0xff]   ;;  %v2984_v49 = vld [vmem:[%s3868_s2 + $0xf0] sm:$0xff]   ;;  %v2987_v52 = vld [vmem:[%s3868_s2 + $0x1b8] sm:$0xff]  }
  0x1e   : > { %v2985_v50 = vld [vmem:[%s3868_s2 + $0x1b0] sm:$0xff]   ;;  %v328_v53 = vld [vmem:[%s3315_s23 + $0xc] sm:$0xf]  ;;  %v2988_v54 = vld [vmem:[%s3868_s2 + $0x140] sm:$0xff]  }
  0x1f   : > { %2645 = vmatpush3.bf16.msra.mxu1 %v2948_v9  ;;  %v331_v55 = vld [vmem:[%s3315_s23 + $0x18] sm:$0xf]  ;;  %v2989_v56 = vld [vmem:[%s3868_s2 + $0x148] sm:$0xff]   ;;  %v2990_v57 = vld [vmem:[%s3868_s2 + $0x150] sm:$0xff]  }
  0x20   : > { %2685 = vmatpush3.bf16.msra.mxu0 %v2949_v10  ;;  %2646 = vmatprep.subr.bf16.mxu1 %v3149_v1  ;;  %v2991_v58 = vld [vmem:[%s3868_s2 + $0x158] sm:$0xff]   ;;  %v2992_v59 = vld [vmem:[%s3868_s2 + $0x160] sm:$0xff]   ;;  %v2993_v60 = vld [vmem:[%s3868_s2 + $0x168] sm:$0xff]  }
  0x21   : > { %2686 = vmatprep.subr.bf16.mxu0 %v3149_v1  ;;  %v3004_v61 = vld [vmem:[%s3870_s4] sm:$0xff]   ;;  %v2994_v62 = vld [vmem:[%s3868_s2 + $0x170] sm:$0xff]   ;;  %v3005_v63 = vld [vmem:[%s3870_s4 + $0x8] sm:$0xff]  }
  0x22   : > { %v2995_v0 = vld [vmem:[%s3868_s2 + $0x178] sm:$0xff]   ;;  %v3006_v2 = vld [vmem:[%s3870_s4 + $0x10] sm:$0xff]   ;;  %v2996_v4 = vld [vmem:[%s3868_s2 + $0x1c0] sm:$0xff]  }
  0x23   : > { %2647 = vmatpush3.bf16.msra.mxu1 %v2950_v11  ;;  %v330_v3 = vld [vmem:[%s3315_s23 + $0x14] sm:$0xf]  ;;  %v3007_v5 = vld [vmem:[%s3870_s4 + $0x18] sm:$0xff]   ;;  %v2997_v6 = vld [vmem:[%s3868_s2 + $0x1c8] sm:$0xff]  }
  0x24   : > { %2687 = vmatpush3.bf16.msra.mxu0 %v2951_v12  ;;  %2648 = vmatprep.subr.bf16.mxu1 %v3149_v1  ;;  %v333_v7 = vld [vmem:[%s3528_s21] sm:$0xf]  ;;  %v2998_v9 = vld [vmem:[%s3868_s2 + $0x1d0] sm:$0xff]   ;;  %v3009_v10 = vld [vmem:[%s3870_s4 + $0x48] sm:$0xff]  }
  0x25   : > { %2688 = vmatprep.subr.bf16.mxu0 %v3149_v1  ;;  %v3008_v8 = vld [vmem:[%s3870_s4 + $0x40] sm:$0xff]   ;;  %v2999_v11 = vld [vmem:[%s3868_s2 + $0x1d8] sm:$0xff]   ;;  %v3010_v12 = vld [vmem:[%s3870_s4 + $0x50] sm:$0xff]  }
  0x27   : > { %2649 = vmatpush3.bf16.msra.mxu1 %v2952_v13  ;;  %v3000_v13 = vld [vmem:[%s3868_s2 + $0x1e0] sm:$0xff]  }
  0x28   : > { %2689 = vmatpush3.bf16.msra.mxu0 %v2953_v14  ;;  %2650 = vmatprep.subr.bf16.mxu1 %v3149_v1  ;;  %v3011_v14 = vld [vmem:[%s3870_s4 + $0x58] sm:$0xff]  }
  0x29   : > { %2690 = vmatprep.subr.bf16.mxu0 %v3149_v1 }
  0x2b   : > { %2651 = vmatpush3.bf16.msra.mxu1 %v2954_v15  ;;  %v3001_v15 = vld [vmem:[%s3868_s2 + $0x1e8] sm:$0xff]  }
  0x2c   : > { %2691 = vmatpush3.bf16.msra.mxu0 %v2955_v16  ;;  %2656 = vmatprep.subr.bf16.mxu1 %v3149_v1  ;;  %v3002_v16 = vld [vmem:[%s3868_s2 + $0x1f0] sm:$0xff]  }
  0x2d   : > { %2716 = vmatprep.subr.bf16.mxu0 %v3149_v1 }
  0x2e   : > { %2653 = vmatmul.mubr.bf16.vlgmr.msra.gmra.mrb[0].mxu1 %v325_v17  ;;  %v335_v17 = vld [vmem:[%s3528_s21 + $0x8] sm:$0xf] }
  0x2f   : > { %2657 = vmatpush3.bf16.msra.mxu1 %v2956_v18  ;;  %2693 = vmatmul.mubr.bf16.vlgmr.msra.gmra.mrb[0].mxu0 %v327_v19  ;;  %v3003_v18 = vld [vmem:[%s3868_s2 + $0x1f8] sm:$0xff]  }
  0x30   : > { %2717 = vmatpush3.bf16.msra.mxu0 %v2957_v20  ;;  %2658 = vmatprep.subr.bf16.mxu1 %v3149_v1  ;;  %v332_v19 = vld [vmem:[%s3315_s23 + $0x1c] sm:$0xf]  ;;  %v3013_v20 = vld [vmem:[%s3870_s4 + $0x20] sm:$0xff]   ;;  %s3085_s23 = scalar_lea.vmem %s3826_s22, 256 }
  0x31   : > { %2718 = vmatprep.subr.bf16.mxu0 %v3149_v1  ;;  %2672 = vmatprep.mubr.msk.bf16.mxu1 %vm3150_vm0, %v3149_v1  ;;  %p3086_p11 = scmp.ne.s32.totalorder %s3826_s22, %s3085_s23 }
  0x32   : > { %2732 = vmatprep.mubr.msk.bf16.mxu0 %vm3150_vm0, %v3149_v1 }
  0x33   : > { %2659 = vmatpush3.bf16.msra.mxu1 %v2958_v21  ;;  %v3014_v21 = vld [vmem:[%s3870_s4 + $0x28] sm:$0xff]   ;;  %p3087_p12 = pnand %p3086_p11, %p3237_p5 }
  0x34   : > { %2719 = vmatpush3.bf16.msra.mxu0 %v2959_v22  ;;  %2660 = vmatprep.subr.bf16.mxu1 %v3149_v1  ;;  %v3015_v22 = vld [vmem:[%s3870_s4 + $0x30] sm:$0xff]  }
  0x35   : > { %2720 = vmatprep.subr.bf16.mxu0 %v3149_v1  ;;  %p3088_p13 = pneg %p3087_p12 }
  0x37   : > { %2661 = vmatpush3.bf16.msra.mxu1 %v2960_v23  ;;  %v3016_v23 = vld [vmem:[%s3870_s4 + $0x38] sm:$0xff]  }
  0x38   : > { %2721 = vmatpush3.bf16.msra.mxu0 %v2961_v24  ;;  %2662 = vmatprep.subr.bf16.mxu1 %v3149_v1  ;;  %v334_v24 = vld [vmem:[%s3528_s21 + $0x4] sm:$0xf] }
  0x39   : > { %2722 = vmatprep.subr.bf16.mxu0 %v3149_v1 }
  0x3b   : > { %2663 = vmatpush3.bf16.msra.mxu1 %v2962_v25  ;;  %v3017_v25 = vld [vmem:[%s3870_s4 + $0x60] sm:$0xff]  }
  0x3c   : > { %2723 = vmatpush3.bf16.msra.mxu0 %v2963_v26  ;;  %2664 = vmatprep.subr.bf16.mxu1 %v3149_v1  ;;  %v3018_v26 = vld [vmem:[%s3870_s4 + $0x68] sm:$0xff]  }
  0x3d   : > { %2724 = vmatprep.subr.bf16.mxu0 %v3149_v1 }
  0x3f   : > { %2665 = vmatpush3.bf16.msra.mxu1 %v2964_v27  ;;  %v3019_v27 = vld [vmem:[%s3870_s4 + $0x70] sm:$0xff]  }
  0x40   : > { %2725 = vmatpush3.bf16.msra.mxu0 %v2965_v28  ;;  %2666 = vmatprep.subr.bf16.mxu1 %v3149_v1  ;;  %v3020_v28 = vld [vmem:[%s3870_s4 + $0x78] sm:$0xff]  }
  0x41   : > { %2726 = vmatprep.subr.bf16.mxu0 %v3149_v1 }
  0x43   : > { %2667 = vmatpush3.bf16.msra.mxu1 %v2966_v29  ;;  %v336_v29 = vld [vmem:[%s3528_s21 + $0xc] sm:$0xf]  ;;  %s3824_s21 = scalar_lea.hbm %s3874_s8, %s2527_s20 }
  0x44   : > { %2727 = vmatpush3.bf16.msra.mxu0 %v2967_v30  ;;  %2668 = vmatprep.subr.bf16.mxu1 %v3149_v1 }
  0x45   : > { %2728 = vmatprep.subr.bf16.mxu0 %v3149_v1 }
  0x47   : > { %2669 = vmatpush3.bf16.msra.mxu1 %v2968_v31 }
  0x48   : > { %2729 = vmatpush3.bf16.msra.mxu0 %v2969_v32  ;;  %2670 = vmatprep.subr.bf16.mxu1 %v3149_v1 }
  0x49   : > { %2730 = vmatprep.subr.bf16.mxu0 %v3149_v1 }
  0x4b   : > { %2671 = vmatpush3.bf16.msra.mxu1 %v2970_v33 }
  0x4c   : > { %2731 = vmatpush3.bf16.msra.mxu0 %v2971_v34  ;;  %2696 = vmatprep.subr.bf16.mxu1 %v3149_v1 }
  0x4d   : > { %2756 = vmatprep.subr.bf16.mxu0 %v3149_v1 }
  0x4e   : > { %2673 = vmatmul.mubr.bf16.vlgmr.msra.gmra.mrb[4].mxu1 %v326_v35 }
  0x4f   : > { %2733 = vmatmul.mubr.bf16.vlgmr.msra.gmra.mrb[4].mxu0 %v329_v36  ;;  %2697 = vmatpush3.bf16.msra.mxu1 %v2972_v37 }
  0x50   : > { %2757 = vmatpush3.bf16.msra.mxu0 %v2973_v38  ;;  %2698 = vmatprep.subr.bf16.mxu1 %v3149_v1  ;;  %v3151_v38 = vmov 1966171168  }
  0x51   : > { %2758 = vmatprep.subr.bf16.mxu0 %v3149_v1  ;;  %2712 = vmatprep.mubr.msk.bf16.mxu1 %vm3150_vm0, %v3149_v1 }
  0x52   : > { %2772 = vmatprep.mubr.msk.bf16.mxu0 %vm3150_vm0, %v3149_v1 }
  0x53   : > { %2699 = vmatpush3.bf16.msra.mxu1 %v2974_v39  ;;  %v469_v39 = vunpack.c.l.s4 %v3151_v38 }
  0x54   : > { %2759 = vmatpush3.bf16.msra.mxu0 %v2975_v40  ;;  %2700 = vmatprep.subr.bf16.mxu1 %v3149_v1  ;;  %v471_v40 = vlaneseq }
  0x55   : > { %2760 = vmatprep.subr.bf16.mxu0 %v3149_v1 }
  0x57   : > { %2701 = vmatpush3.bf16.msra.mxu1 %v2976_v41  ;;  %v470_v41 = vunpack.c.0.s8 %v469_v39 }
  0x58   : > { %2761 = vmatpush3.bf16.msra.mxu0 %v2977_v42  ;;  %2702 = vmatprep.subr.bf16.mxu1 %v3149_v1  ;;  %v3629_v42 = vshrl.u32 %v471_v40, 7 }
  0x59   : > { %2762 = vmatprep.subr.bf16.mxu0 %v3149_v1 }
  0x5b   : > { %2703 = vmatpush3.bf16.msra.mxu1 %v2978_v43  ;;  %v465_v43 = vld [vmem:[%s3869_s3] sm:$0xff] }
  0x5c   : > { %2763 = vmatpush3.bf16.msra.mxu0 %v2979_v44  ;;  %2704 = vmatprep.subr.bf16.mxu1 %v3149_v1  ;;  %v467_v44 = vcombine.high %v465_v43, %v465_v43 }
  0x5d   : > { %2764 = vmatprep.subr.bf16.mxu0 %v3149_v1 }
  0x5f   : > { %2705 = vmatpush3.bf16.msra.mxu1 %v2980_v45  ;;  %v3635_v45 = vsub.s32 %v470_v41, %v3629_v42 }
  0x60   : > { %2765 = vmatpush3.bf16.msra.mxu0 %v2981_v46  ;;  %2706 = vmatprep.subr.bf16.mxu1 %v3149_v1 }
  0x61   : > { %2766 = vmatprep.subr.bf16.mxu0 %v3149_v1  ;;  %v481_v46 = vrot.slane %v467_v44, %v3635_v45 }
  0x63   : > { %2707 = vmatpush3.bf16.msra.mxu1 %v2982_v47  ;;  %v497_v47 = vrot.slane %v481_v46, %v3635_v45 }
  0x64   : > { %2767 = vmatpush3.bf16.msra.mxu0 %v2983_v48  ;;  %2708 = vmatprep.subr.bf16.mxu1 %v3149_v1  ;;  %v474_v48 = vrot.slane %v465_v43, %v3635_v45 }
  0x65   : > { %2768 = vmatprep.subr.bf16.mxu0 %v3149_v1 }
  0x67   : > { %2709 = vmatpush3.bf16.msra.mxu1 %v2984_v49  ;;  %v3641_v49 = vsub.s32 0, %v3629_v42 }
  0x68   : > { %2769 = vmatpush3.bf16.msra.mxu0 %v2985_v50  ;;  %2710 = vmatprep.subr.bf16.mxu1 %v3149_v1 }
  0x69   : > { %2770 = vmatprep.subr.bf16.mxu0 %v3149_v1  ;;  %v535_v50 = vrot.slane %v497_v47, %v3641_v49 }
  0x6b   : > { %2711 = vmatpush3.bf16.msra.mxu1 %v2986_v51  ;;  %v490_v51 = vrot.slane %v474_v48, %v3635_v45 }
  0x6c   : > { %2771 = vmatpush3.bf16.msra.mxu0 %v2987_v52  ;;  %2736 = vmatprep.subr.bf16.mxu1 %v3149_v1 }
  0x6d   : > { %2796 = vmatprep.subr.bf16.mxu0 %v3149_v1 }
  0x6e   : > { %2713 = vmatmul.mubr.bf16.vlgmr.msra.gmra.mrb[8].mxu1 %v328_v53 }
  0x6f   : > { %2773 = vmatmul.mubr.bf16.vlgmr.msra.gmra.mrb[8].mxu0 %v331_v55  ;;  %2737 = vmatpush3.bf16.msra.mxu1 %v2988_v54 }
  0x70   : > { %2738 = vmatprep.subr.bf16.mxu1 %v3149_v1  ;;  %2752 = vmatprep.mubr.msk.bf16.mxu1 %vm3150_vm0, %v3149_v1 }
  0x71   : > { %2804 = vmatprep.mubr.msk.bf16.mxu0 %vm3150_vm0, %v3149_v1  ;;  %2797 = vmatpush3.bf16.msra.mxu0 %v3004_v61 }
  0x72   : > { %2798 = vmatprep.subr.bf16.mxu0 %v3149_v1 }
  0x73   : > { %2739 = vmatpush3.bf16.msra.mxu1 %v2989_v56 }
  0x74   : > { %2740 = vmatprep.subr.bf16.mxu1 %v3149_v1 }
  0x75   : > { %2799 = vmatpush3.bf16.msra.mxu0 %v3005_v63 }
  0x76   : > { %2800 = vmatprep.subr.bf16.mxu0 %v3149_v1 }
  0x77   : > { %2741 = vmatpush3.bf16.msra.mxu1 %v2990_v57 }
  0x78   : > { %2742 = vmatprep.subr.bf16.mxu1 %v3149_v1 }
  0x79   : > { %2801 = vmatpush3.bf16.msra.mxu0 %v3006_v2 }
  0x7a   : > { %2802 = vmatprep.subr.bf16.mxu0 %v3149_v1 }
  0x7b   : > { %2743 = vmatpush3.bf16.msra.mxu1 %v2991_v58 }
  0x7c   : > { %2744 = vmatprep.subr.bf16.mxu1 %v3149_v1 }
  0x7d   : > { %2803 = vmatpush3.bf16.msra.mxu0 %v3007_v5 }
  0x7e   : > { %2820 = vmatprep.subr.bf16.mxu0 %v3149_v1 }
  0x7f   : > { %2745 = vmatpush3.bf16.msra.mxu1 %v2992_v59 }
  0x80   : > { %2746 = vmatprep.subr.bf16.mxu1 %v3149_v1  ;;  %2805 = vmatmul.mubr.msk.bf16.vlgmr.msra.gmra.mrb[12].mxu0 %vm1362_vm1, %v333_v7 }
  0x81   : > { %2821 = vmatpush3.bf16.msra.mxu0 %v3008_v8  ;;  %2828 = vmatprep.mubr.msk.bf16.mxu0 %vm3150_vm0, %v3149_v1 }
  0x82   : > { %2822 = vmatprep.subr.bf16.mxu0 %v3149_v1 }
  0x83   : > { %2747 = vmatpush3.bf16.msra.mxu1 %v2993_v60  ;;  %v519_v60 = vrot.slane %v490_v51, %v3641_v49 }
  0x84   : > { %2748 = vmatprep.subr.bf16.mxu1 %v3149_v1 }
  0x85   : > { %2823 = vmatpush3.bf16.msra.mxu0 %v3009_v10 }
  0x86   : > { %2824 = vmatprep.subr.bf16.mxu0 %v3149_v1 }
  0x87   : > { %2749 = vmatpush3.bf16.msra.mxu1 %v2994_v62 }
  0x88   : > { %2750 = vmatprep.subr.bf16.mxu1 %v3149_v1 }
  0x89   : > { %2825 = vmatpush3.bf16.msra.mxu0 %v3010_v12 }
  0x8a   : > { %2826 = vmatprep.subr.bf16.mxu0 %v3149_v1 }
  0x8b   : > { %2751 = vmatpush3.bf16.msra.mxu1 %v2995_v0 }
  0x8c   : > { %2776 = vmatprep.subr.bf16.mxu1 %v3149_v1 }
  0x8d   : > { %2827 = vmatpush3.bf16.msra.mxu0 %v3011_v14 }
  0x8e   : > { %2753 = vmatmul.mubr.bf16.vlgmr.msra.gmra.mrb[12].mxu1 %v330_v3  ;;  %2844 = vmatprep.subr.bf16.mxu0 %v3149_v1  ;;  %v513_v3 = vcombine.high %v497_v47, %v497_v47 }
  0x8f   : > { %2777 = vmatpush3.bf16.msra.mxu1 %v2996_v4  ;;  %2792 = vmatprep.mubr.msk.bf16.mxu1 %vm3150_vm0, %v3149_v1  ;;  %v512_v4 = vcombine.high %v490_v51, %v490_v51 }
  0x90   : > { %2778 = vmatprep.subr.bf16.mxu1 %v3149_v1  ;;  %2829 = vmatmul.mubr.msk.bf16.vlgmr.msra.gmra.mrb[16].mxu0 %vm1362_vm1, %v335_v17  ;;  %v543_v5 = vrot.slane %v513_v3, %v3641_v49 }
  0x91   : > { %2846 = vmatprep.mubr.msk.bf16.mxu0 %vm3150_vm0, %v3149_v1 }
  0x93   : > { %2779 = vmatpush3.bf16.msra.mxu1 %v2997_v6 }
  0x94   : > { %2780 = vmatprep.subr.bf16.mxu1 %v3149_v1 }
  0x97   : > { %2781 = vmatpush3.bf16.msra.mxu1 %v2998_v9  ;;  %v527_v9 = vrot.slane %v512_v4, %v3641_v49 }
  0x98   : > { %2782 = vmatprep.subr.bf16.mxu1 %v3149_v1 }
  0x9b   : > { %2783 = vmatpush3.bf16.msra.mxu1 %v2999_v11 }
  0x9c   : > { %2784 = vmatprep.subr.bf16.mxu1 %v3149_v1 }
  0x9f   : > { %2785 = vmatpush3.bf16.msra.mxu1 %v3000_v13 }
  0xa0   : > { %2786 = vmatprep.subr.bf16.mxu1 %v3149_v1 }
  0xa3   : > { %2787 = vmatpush3.bf16.msra.mxu1 %v3001_v15 }
  0xa4   : > { %2788 = vmatprep.subr.bf16.mxu1 %v3149_v1 }
  0xa7   : > { %2789 = vmatpush3.bf16.msra.mxu1 %v3002_v16 }
  0xa8   : > { %2790 = vmatprep.subr.bf16.mxu1 %v3149_v1 }
  0xab   : > { %2791 = vmatpush3.bf16.msra.mxu1 %v3003_v18 }
  0xac   : > { %2808 = vmatprep.subr.bf16.mxu1 %v3149_v1 }
  0xae   : > { %2793 = vmatmul.mubr.bf16.vlgmr.msra.gmra.mrb[16].mxu1 %v332_v19 }
  0xaf   : > { %2816 = vmatprep.mubr.msk.bf16.mxu1 %vm3150_vm0, %v3149_v1  ;;  %2809 = vmatpush3.bf16.msra.mxu1 %v3013_v20  ;;  %v483_v20 = vcombine.high %v481_v46, %v481_v46 }
  0xb0   : > { %2810 = vmatprep.subr.bf16.mxu1 %v3149_v1 }
  0xb3   : > { %2811 = vmatpush3.bf16.msra.mxu1 %v3014_v21  ;;  %v511_v21 = vrot.slane %v483_v20, %v3635_v45 }
  0xb4   : > { %2812 = vmatprep.subr.bf16.mxu1 %v3149_v1 }
  0xb7   : > { %2813 = vmatpush3.bf16.msra.mxu1 %v3015_v22  ;;  %v482_v22 = vcombine.high %v474_v48, %v474_v48 }
  0xb8   : > { %2814 = vmatprep.subr.bf16.mxu1 %v3149_v1 }
  0xbb   : > { %2815 = vmatpush3.bf16.msra.mxu1 %v3016_v23  ;;  %v539_v23 = vrot.slane %v511_v21, %v3641_v49 }
  0xbc   : > { %2832 = vmatprep.subr.bf16.mxu1 %v3149_v1 }
  0xbe   : > { %2817 = vmatmul.mubr.msk.bf16.vlgmr.msra.gmra.mrb[20].mxu1 %vm1362_vm1, %v334_v24  ;;  %v2459_v24 = vld.sshfl [vmem:[%s3871_s5] sm:$0x33 pattern:$0x75316420] }
  0xbf   : > { %2833 = vmatpush3.bf16.msra.mxu1 %v3017_v25  ;;  %2840 = vmatprep.mubr.msk.bf16.mxu1 %vm3150_vm0, %v3149_v1  ;;  %v1308_v25 = vrot.slane %v2459_v24, %v3635_v45 }
  0xc0   : > { %2834 = vmatprep.subr.bf16.mxu1 %v3149_v1 }
  0xc1   : > { %v1316_v47 = vcombine.high %v1308_v25, %v1308_v25 }
  0xc3   : > { %2835 = vmatpush3.bf16.msra.mxu1 %v3018_v26  ;;  %v504_v26 = vrot.slane %v482_v22, %v3635_v45  ;;  %v1329_v48 = vrot.slane %v1316_v47, %v3641_v49 }
  0xc4   : > { %2836 = vmatprep.subr.bf16.mxu1 %v3149_v1 }
  0xc7   : > { %2837 = vmatpush3.bf16.msra.mxu1 %v3019_v27 }
  0xc8   : > { %2838 = vmatprep.subr.bf16.mxu1 %v3149_v1 }
  0xcb   : > { %2839 = vmatpush3.bf16.msra.mxu1 %v3020_v28 }
  0xcc   : > { %2850 = vmatprep.subr.bf16.mxu1 %v3149_v1 }
  0xce   : > { %2841 = vmatmul.mubr.msk.bf16.vlgmr.msra.gmra.mrb[24].mxu1 %vm1362_vm1, %v336_v29 }
  0xcf   : > { %2852 = vmatprep.mubr.msk.bf16.mxu1 %vm3150_vm0, %v3149_v1 }
 0x101   : > { %v638_v30 = vpop.f32.mrb[0].mxu1 }
 0x102   : > { %v2654_v31 = vpop.f32.mrb[1].mxu1  ;;  %v814_v32 = vpop.f32.mrb[0].mxu0  ;;  %v639_v0 = vadd.f32 %v638_v30, %v519_v60 }
 0x103   : > { %v641_v33 = vpop.f32.mrb[2].mxu1  ;;  %v2694_v34 = vpop.f32.mrb[1].mxu0  ;;  %v815_v17 = vadd.f32 %v814_v32, %v527_v9  ;;  %v1321_v31 = vrot.slane %v1308_v25, %v3641_v49  ;;  %v523_v32 = vrot.slane %v504_v26, %v3641_v49 }
 0x104   : > { %v2655_v35 = vpop.f32.mrb[3].mxu1  ;;  %v817_v36 = vpop.f32.mrb[2].mxu0  ;;  %v1607_v2 = vpack.c.bf16 %v639_v0, %v639_v0 }
 0x105   : > { %v2695_v37 = vpop.f32.mrb[3].mxu0  ;;  %v1609_v19 = vpack.c.bf16 %v815_v17, %v815_v17 }
 0x121   : > { %v726_v52 = vpop.f32.mrb[4].mxu1 }
 0x122   : > { %v990_v53 = vpop.f32.mrb[4].mxu0  ;;  %v2674_v54 = vpop.f32.mrb[5].mxu1  ;;  %v727_v39 = vadd.f32 %v726_v52, %v523_v32 }
 0x123   : > { %v991_v55 = vadd.f32 %v990_v53, %v535_v50  ;;  %v729_v56 = vpop.f32.mrb[6].mxu1  ;;  %v2734_v57 = vpop.f32.mrb[5].mxu0  ;;  %v515_v50 = vcombine.high %v511_v21, %v511_v21 }
 0x124   : > { %v2675_v58 = vpop.f32.mrb[7].mxu1  ;;  %v993_v59 = vpop.f32.mrb[6].mxu0  ;;  %v1608_v46 = vpack.c.bf16 %v727_v39, %v727_v39  ;;  %v514_v57 = vcombine.high %v504_v26, %v504_v26 }
 0x125   : > { %v1611_v61 = vpack.c.bf16 %v991_v55, %v991_v55  ;;  %v2735_v62 = vpop.f32.mrb[7].mxu0  ;;  %v547_v56 = vrot.slane %v515_v50, %v3641_v49 }
 0x126   : > { %v531_v62 = vrot.slane %v514_v57, %v3641_v49 }
 0x127   : > { %v1619_v63 = vsel %vm1362_vm1, %v1611_v61, 0 }
 0x128   : > { %2845 = vmatpush3.bf16.xpose.msra.mxu0 %v1619_v63 }
 0x129   : > { %2856 = vmatprep.subr.bf16.mxu0 %v3149_v1 }
 0x12f   : > { %2847 = vmatmul.mubr.msk.bf16.vlgmr.msra.gmra.mrb[20].mxu0 %vm1362_vm1, %v1607_v2 }
 0x130   : > { %2858 = vmatprep.mubr.msk.bf16.mxu0 %vm3150_vm0, %v3149_v1 }
 0x141   : > { %v3652_v6 = vpop.f32.mrb[8].mxu1 }
 0x142   : > { %v1166_v7 = vpop.f32.mrb[8].mxu0  ;;  %v2714_v8 = vpop.f32.mrb[9].mxu1  ;;  %v903_v3 = vadd.f32 %v3652_v6, %v531_v62 }
 0x143   : > { %v1167_v10 = vadd.f32 %v1166_v7, %v543_v5  ;;  %v905_v11 = vpop.f32.mrb[10].mxu1  ;;  %v2774_v12 = vpop.f32.mrb[9].mxu0  ;;  %v1301_v5 = vcombine.high %v2459_v24, %v2459_v24 }
 0x144   : > { %v2715_v13 = vpop.f32.mrb[11].mxu1  ;;  %v1169_v14 = vpop.f32.mrb[10].mxu0  ;;  %v1610_v4 = vpack.c.bf16 %v903_v3, %v903_v3 }
 0x145   : > { %v1613_v15 = vpack.c.bf16 %v1167_v10, %v1167_v10  ;;  %v2775_v16 = vpop.f32.mrb[11].mxu0  ;;  %v1315_v9 = vrot.slane %v1301_v5, %v3635_v45 }
 0x147   : > { %v1711_v18 = vsel %vm1362_vm1, %v1613_v15, 0  ;;  %v1325_v12 = vrot.slane %v1315_v9, %v3641_v49  ;;  %v1317_v15 = vcombine.high %v1315_v9, %v1315_v9 }
 0x148   : > { %2857 = vmatpush3.bf16.xpose.msra.mxu0 %v1711_v18 }
 0x149   : > { %2868 = vmatprep.subr.bf16.mxu0 %v3149_v1  ;;  %v1333_v16 = vrot.slane %v1317_v15, %v3641_v49 }
 0x14f   : > { %2859 = vmatmul.mubr.msk.bf16.vlgmr.msra.gmra.mrb[24].mxu0 %vm1362_vm1, %v1609_v19 }
 0x150   : > { %2870 = vmatprep.mubr.msk.bf16.mxu0 %vm3150_vm0, %v3149_v1 }
 0x153   : > { %v1400_v36 = vpop.f32.mrb[12].mxu0 }
 0x154   : > { %v1401_v37 = vadd.f32 %v1400_v36, %v1321_v31  ;;  %v2806_v38 = vpop.f32.mrb[13].mxu0 }
 0x155   : > { %v1403_v40 = vpop.f32.mrb[14].mxu0 }
 0x156   : > { %v1852_v41 = vpack.c.bf16 %v1401_v37, %v1401_v37  ;;  %v2807_v43 = vpop.f32.mrb[15].mxu0 }
 0x158   : > { %v1861_v44 = vsel %vm1859_vm2, %v1852_v41, 0 }
 0x159   : > { %2869 = vmatpush3.bf16.msra.mxu0 %v1861_v44 }
 0x15a   : > { %2880 = vmatprep.subr.bf16.mxu0 %v3149_v1 }
 0x161   : > { %v1078_v27 = vpop.f32.mrb[12].mxu1 }
 0x162   : > { %v1079_v28 = vadd.f32 %v1078_v27, %v539_v23  ;;  %v2754_v29 = vpop.f32.mrb[13].mxu1 }
 0x163   : > { %v1081_v30 = vpop.f32.mrb[14].mxu1  ;;  %v1534_v51 = vpop.f32.mrb[16].mxu0 }
 0x164   : > { %v1612_v33 = vpack.c.bf16 %v1079_v28, %v1079_v28  ;;  %v2755_v34 = vpop.f32.mrb[15].mxu1  ;;  %v3677_v52 = vadd.f32 %v1534_v51, %v1329_v48  ;;  %v2830_v53 = vpop.f32.mrb[17].mxu0 }
 0x165   : > { %v1537_v54 = vpop.f32.mrb[18].mxu0 }
 0x166   : > { %v1665_v35 = vsel %vm1362_vm1, %v1612_v33, 0  ;;  %v2831_v55 = vpop.f32.mrb[19].mxu0 }
 0x167   : > { %2851 = vmatpush3.bf16.xpose.msra.mxu1 %v1665_v35 }
 0x168   : > { %2862 = vmatprep.subr.bf16.mxu1 %v3149_v1 }
 0x16e   : > { %2853 = vmatmul.mubr.msk.bf16.vlgmr.msra.gmra.mrb[28].mxu1 %vm1362_vm1, %v1608_v46 }
 0x16f   : > { %2864 = vmatprep.mubr.msk.bf16.mxu1 %vm3150_vm0, %v3149_v1 }
 0x181   : > { %v1254_v58 = vpop.f32.mrb[16].mxu1 }
 0x182   : > { %v1255_v59 = vadd.f32 %v1254_v58, %v547_v56  ;;  %v2794_v60 = vpop.f32.mrb[17].mxu1 }
 0x183   : > { %v1257_v61 = vpop.f32.mrb[18].mxu1 }
 0x184   : > { %v1614_v63 = vpack.c.bf16 %v1255_v59, %v1255_v59  ;;  %v2795_v0 = vpop.f32.mrb[19].mxu1 }
 0x186   : > { %v1757_v2 = vsel %vm1362_vm1, %v1614_v63, 0 }
 0x187   : > { %2863 = vmatpush3.bf16.xpose.msra.mxu1 %v1757_v2 }
 0x188   : > { %2874 = vmatprep.subr.bf16.mxu1 %v3149_v1 }
 0x18e   : > { %2865 = vmatmul.mubr.msk.bf16.vlgmr.msra.gmra.mrb[32].mxu1 %vm1362_vm1, %v1610_v4 }
 0x18f   : > { %2876 = vmatprep.mubr.msk.bf16.mxu1 %vm3150_vm0, %v3149_v1 }
 0x191   : > { %v1467_v7 = vpop.f32.mrb[20].mxu1 }
 0x192   : > { %v2818_v8 = vpop.f32.mrb[21].mxu1  ;;  %v1468_v13 = vadd.f32 %v1467_v7, %v1325_v12 }
 0x193   : > { %v1470_v10 = vpop.f32.mrb[22].mxu1 }
 0x194   : > { %v2819_v11 = vpop.f32.mrb[23].mxu1  ;;  %v1853_v14 = vpack.c.bf16 %v1468_v13, %v1468_v13 }
 0x196   : > { %v1907_v6 = vsel %vm1859_vm2, %v1853_v14, 0  ;;  %v1854_v14 = vpack.c.bf16 %v3677_v52, %v3677_v52 }
 0x197   : > { %2875 = vmatpush3.bf16.msra.mxu1 %v1907_v6 }
 0x198   : > { %2886 = vmatprep.subr.bf16.mxu1 %v3149_v1 }
 0x1a1   : > { %v1601_v17 = vpop.f32.mrb[24].mxu1 }
 0x1a2   : > { %v3692_v18 = vadd.f32 %v1601_v17, %v1333_v16  ;;  %v2842_v19 = vpop.f32.mrb[25].mxu1  ;;  %v1953_v17 = vsel %vm1859_vm2, %v1854_v14, 0 }
 0x1a3   : > { %v1604_v20 = vpop.f32.mrb[26].mxu1 }
 0x1a4   : > { %v2843_v45 = vpop.f32.mrb[27].mxu1  ;;  %v1855_v10 = vpack.c.bf16 %v3692_v18, %v3692_v18 }
 0x1a6   : > { %v1999_v6 = vsel %vm1859_vm2, %v1855_v10, 0 }
 0x202   : > { %v1655_v21 = vpop.f32.mrb[20].mxu0 }
 0x203   : > { %v1799_v22 = vmul.f32 0.088388346, %v1655_v21  ;;  %v2848_v23 = vpop.f32.mrb[21].mxu0 }
 0x204   : > { %v1658_v24 = vpop.f32.mrb[22].mxu0 }
 0x205   : > { %v2849_v25 = vpop.f32.mrb[23].mxu0  ;;  %v1804_v26 = vsel %vm1803_vm3, %v1799_v22, -inf  ;;  %v3021_v24 = vld [vmem:[%s3872_s6] ss:$8 sps:$4 sm:$0xff]  }
 0x206   : > { %1805 = vmax.xlane.f32.xlu1 %v1804_v26  ;;  %v3026_v25 = vld [vmem:[%s3872_s6 + $0x14] ss:$8 sps:$4 sm:$0xff]   ;;  %v3024_v26 = vld [vmem:[%s3872_s6 + $0x10] ss:$8 sps:$4 sm:$0xff]  }
 0x222   : > { %v1747_v27 = vpop.f32.mrb[24].mxu0 }
 0x223   : > { %v1801_v28 = vmul.f32 0.088388346, %v1747_v27  ;;  %v2860_v29 = vpop.f32.mrb[25].mxu0  ;;  %v3029_v27 = vld [vmem:[%s3872_s6 + $0x24] ss:$8 sps:$4 sm:$0xff]  }
 0x224   : > { %v1750_v30 = vpop.f32.mrb[26].mxu0  ;;  %v3032_v29 = vld [vmem:[%s3872_s6 + $0x34] ss:$8 sps:$4 sm:$0xff]  }
 0x225   : > { %v1810_v31 = vsel %vm1803_vm3, %v1801_v28, -inf  ;;  %v2861_v32 = vpop.f32.mrb[27].mxu0  ;;  %v3030_v30 = vld [vmem:[%s3872_s6 + $0x30] ss:$8 sps:$4 sm:$0xff]  }
 0x226   : > { %1811 = vmax.xlane.f32.xlu1 %v1810_v31  ;;  %v3035_v31 = vld [vmem:[%s3872_s6 + $0x44] ss:$8 sps:$4 sm:$0xff]   ;;  %v3033_v32 = vld [vmem:[%s3872_s6 + $0x40] ss:$8 sps:$4 sm:$0xff]  }
 0x241   : > { %v1701_v33 = vpop.f32.mrb[28].mxu1 }
 0x242   : > { %v1800_v34 = vmul.f32 0.088388346, %v1701_v33  ;;  %v2854_v35 = vpop.f32.mrb[29].mxu1  ;;  %v3038_v33 = vld [vmem:[%s3872_s6 + $0x54] ss:$8 sps:$4 sm:$0xff]  }
 0x243   : > { %v1704_v36 = vpop.f32.mrb[30].mxu1  ;;  %v3041_v35 = vld [vmem:[%s3872_s6 + $0x64] ss:$8 sps:$4 sm:$0xff]  }
 0x244   : > { %v2855_v37 = vpop.f32.mrb[31].mxu1  ;;  %v1807_v38 = vsel %vm1803_vm3, %v1800_v34, -inf  ;;  %v3039_v36 = vld [vmem:[%s3872_s6 + $0x60] ss:$8 sps:$4 sm:$0xff]  }
 0x245   : > { %1808 = vmax.xlane.f32.xlu0 %v1807_v38  ;;  %v3044_v37 = vld [vmem:[%s3872_s6 + $0x74] ss:$8 sps:$4 sm:$0xff]   ;;  %v3042_v38 = vld [vmem:[%s3872_s6 + $0x70] ss:$8 sps:$4 sm:$0xff]  }
 0x261   : > { %v1793_v39 = vpop.f32.mrb[32].mxu1 }
 0x262   : > { %v1802_v40 = vmul.f32 0.088388346, %v1793_v39  ;;  %v2866_v41 = vpop.f32.mrb[33].mxu1  ;;  %v3047_v39 = vld [vmem:[%s3872_s6 + $0x84] ss:$8 sps:$4 sm:$0xff]  }
 0x263   : > { %v1796_v43 = vpop.f32.mrb[34].mxu1  ;;  %v3050_v41 = vld [vmem:[%s3872_s6 + $0x94] ss:$8 sps:$4 sm:$0xff]  }
 0x264   : > { %v2867_v44 = vpop.f32.mrb[35].mxu1  ;;  %v1813_v46 = vsel %vm1803_vm3, %v1802_v40, -inf  ;;  %v3048_v43 = vld [vmem:[%s3872_s6 + $0x90] ss:$8 sps:$4 sm:$0xff]  }
 0x265   : > { %1814 = vmax.xlane.f32.xlu0 %v1813_v46  ;;  %v3053_v44 = vld [vmem:[%s3872_s6 + $0xa4] ss:$8 sps:$4 sm:$0xff]   ;;  %v3051_v46 = vld [vmem:[%s3872_s6 + $0xa0] ss:$8 sps:$4 sm:$0xff]  }
 0x293   : > { %v1806_v47 = vpop.xlane.xlu1 %1805 }
 0x294   : > { %v1816_v48 = vsub.f32 %v1799_v22, %v1806_v47  ;;  %v3056_v47 = vld [vmem:[%s3872_s6 + $0xb4] ss:$8 sps:$4 sm:$0xff]  }
 0x296   : > { %v1820_v53 = vmul.f32 1.442695, %v1816_v48  ;;  %v3054_v48 = vld [vmem:[%s3872_s6 + $0xb0] ss:$8 sps:$4 sm:$0xff]  }
 0x2b3   : > { %v1812_v59 = vpop.xlane.xlu1 %1811 }
 0x2b4   : > { %v1818_v60 = vsub.f32 %v1801_v28, %v1812_v59  ;;  %v3027_v28 = vld [vmem:[%s3872_s6 + $0x20] ss:$8 sps:$4 sm:$0xff]  }
 0x2b6   : > { %v1824_v63 = vmul.f32 1.442695, %v1818_v60 }
 0x2d2   : > { %v1809_v50 = vpop.xlane.xlu0 %1808 }
 0x2d3   : > { %v1817_v51 = vsub.f32 %v1800_v34, %v1809_v50  ;;  %v3036_v34 = vld [vmem:[%s3872_s6 + $0x50] ss:$8 sps:$4 sm:$0xff]   ;;  %v3059_v50 = vld [vmem:[%s3872_s6 + $0xc4] ss:$8 sps:$4 sm:$0xff]  }
 0x2d5   : > { %v1822_v54 = vmul.f32 1.442695, %v1817_v51  ;;  %v3057_v51 = vld [vmem:[%s3872_s6 + $0xc0] ss:$8 sps:$4 sm:$0xff]  }
 0x2d7   : > { %3069 = vpow2.f32 %v1822_v54  ;;  %v3060_v54 = vld [vmem:[%s3872_s6 + $0xd0] ss:$8 sps:$4 sm:$0xff]  }
 0x2d8   : > { %3071 = vpow2.f32 %v1820_v53  ;;  %v3062_v53 = vld [vmem:[%s3872_s6 + $0xd4] ss:$8 sps:$4 sm:$0xff]  }
 0x2e1   : > { %v3070_v55 = vpop.eup %3069 }
 0x2e2   : > { %v1831_v56 = vsel %vm1803_vm3, %v3070_v55, 0.0  ;;  %v3072_v57 = vpop.eup %3071 }
 0x2e3   : > { %1832 = vadd.xlane.f32.xlu0 %v1831_v56  ;;  %v1828_v58 = vsel %vm1803_vm3, %v3072_v57, 0.0  ;;  %v3063_v56 = vld [vmem:[%s3872_s6 + $0xe0] ss:$8 sps:$4 sm:$0xff]  }
 0x2e7   : > { %1829 = vadd.xlane.f32.xlu0 %v1828_v58 }
 0x2f2   : > { %v1815_v61 = vpop.xlane.xlu0 %1814 }
 0x2f3   : > { %v1819_v62 = vsub.f32 %v1802_v40, %v1815_v61  ;;  %v3045_v40 = vld [vmem:[%s3872_s6 + $0x80] ss:$8 sps:$4 sm:$0xff]  }
 0x2f5   : > { %v1826_v0 = vmul.f32 1.442695, %v1819_v62 }
 0x2f7   : > { %3073 = vpow2.f32 %v1826_v0 }
 0x2f8   : > { %3075 = vpow2.f32 %v1824_v63 }
 0x301   : > { %v3074_v2 = vpop.eup %3073 }
 0x302   : > { %v1837_v3 = vsel %vm1803_vm3, %v3074_v2, 0.0  ;;  %v3076_v4 = vpop.eup %3075 }
 0x303   : > { %1838 = vadd.xlane.f32.xlu1 %v1837_v3  ;;  %v1834_v5 = vsel %vm1803_vm3, %v3076_v4, 0.0  ;;  %v3066_v3 = vld [vmem:[%s3872_s6 + $0xf0] ss:$8 sps:$4 sm:$0xff]  }
 0x307   : > { %1835 = vadd.xlane.f32.xlu1 %v1834_v5 }
 0x370   : > { %v1833_v7 = vpop.xlane.xlu0 %1832 }
 0x371   : > { %3077 = vrcp.f32 %v1833_v7 }
 0x374   : > { %v1830_v8 = vpop.xlane.xlu0 %1829 }
 0x375   : > { %3079 = vrcp.f32 %v1830_v8 }
 0x37b   : > { %v3078_v9 = vpop.eup %3077 }
 0x37c   : > { %v1845_v11 = vmul.f32 %v3078_v9, %v3070_v55  ;;  %v3065_v55 = vld [vmem:[%s3872_s6 + $0xe4] ss:$8 sps:$4 sm:$0xff]  }
 0x37e   : > { %v1849_v12 = vpack.c.bf16 %v1845_v11, %v1845_v11 }
 0x37f   : > { %v3080_v13 = vpop.eup %3079 }
 0x380   : > { %v1844_v15 = vmul.f32 %v3080_v13, %v3072_v57  ;;  %2877 = vmatmul.mubr.msk.bf16.vlgmr.msra.gmra.mrb[36].mxu1 %vm1803_vm3, %v1849_v12 }
 0x381   : > { %2887 = vmatpush3.bf16.msra.mxu1 %v1999_v6  ;;  %2888 = vmatprep.mubr.msk.bf16.mxu1 %vm3150_vm0, %v3149_v1 }
 0x382   : > { %v1848_v16 = vpack.c.bf16 %v1844_v15, %v1844_v15 }
 0x384   : > { %2871 = vmatmul.mubr.msk.bf16.vlgmr.msra.gmra.mrb[28].mxu0 %vm1803_vm3, %v1848_v16 }
 0x385   : > { %2881 = vmatpush3.bf16.msra.mxu0 %v1953_v17  ;;  %2882 = vmatprep.mubr.msk.bf16.mxu0 %vm3150_vm0, %v3149_v1  ;;  %v3023_v1 = vld [vmem:[%s3872_s6 + $0x4] ss:$8 sps:$4 sm:$0xff]  }
 0x386   : > { %2257 = vmatprep.subr.bf16.mxu0 %v3023_v1 }
 0x390   : > { %v1839_v18 = vpop.xlane.xlu1 %1838 }
 0x391   : > { %3081 = vrcp.f32 %v1839_v18 }
 0x394   : > { %v1836_v52 = vpop.xlane.xlu1 %1835 }
 0x395   : > { %3083 = vrcp.f32 %v1836_v52 }
 0x39b   : > { %v3082_v19 = vpop.eup %3081 }
 0x39c   : > { %v1847_v20 = vmul.f32 %v3082_v19, %v3074_v2  ;;  %v3068_v2 = vld [vmem:[%s3872_s6 + $0xf4] ss:$8 sps:$4 sm:$0xff]   ;;  %v2085_v19 = vld [vmem:[%s3873_s7] sm:$0x3] }
 0x39e   : > { %v1851_v45 = vpack.c.bf16 %v1847_v20, %v1847_v20  ;;  %v2093_v20 = vsub.s32 1, %v3629_v42 }
 0x39f   : > { %v3084_v21 = vpop.eup %3083 }
 0x3a0   : > { %v1846_v22 = vmul.f32 %v3084_v21, %v3076_v4  ;;  %2889 = vmatmul.mubr.msk.bf16.vlgmr.msra.gmra.mrb[40].mxu1 %vm1803_vm3, %v1851_v45  ;;  %v2090_v45 = vrot.slane %v2085_v19, %v3641_v49  ;;  %v2094_v21 = vrot.slane %v2085_v19, %v2093_v20 }
 0x3a2   : > { %v1850_v23 = vpack.c.bf16 %v1846_v22, %v1846_v22 }
 0x3a4   : > { %2883 = vmatmul.mubr.msk.bf16.vlgmr.msra.gmra.mrb[32].mxu0 %vm1803_vm3, %v1850_v23 }
 0x3a5   : > { %2258 = vmatpush1.bf16.msra.mxu0 %v3021_v24 }
 0x3a6   : > { %2259 = vmatprep.subr.bf16.mxu0 %v3026_v25 }
 0x3a9   : > { %2260 = vmatpush1.bf16.msra.mxu0 %v3024_v26 }
 0x3aa   : > { %2261 = vmatprep.subr.bf16.mxu0 %v3029_v27 }
 0x3ad   : > { %2262 = vmatpush1.bf16.msra.mxu0 %v3027_v28 }
 0x3ae   : > { %2263 = vmatprep.subr.bf16.mxu0 %v3032_v29 }
 0x3b1   : > { %2264 = vmatpush1.bf16.msra.mxu0 %v3030_v30 }
 0x3b2   : > { %2265 = vmatprep.subr.bf16.mxu0 %v3035_v31 }
 0x3b5   : > { %2266 = vmatpush1.bf16.msra.mxu0 %v3033_v32 }
 0x3b6   : > { %2267 = vmatprep.subr.bf16.mxu0 %v3038_v33 }
 0x3b9   : > { %2268 = vmatpush1.bf16.msra.mxu0 %v3036_v34 }
 0x3ba   : > { %2269 = vmatprep.subr.bf16.mxu0 %v3041_v35 }
 0x3bd   : > { %2270 = vmatpush1.bf16.msra.mxu0 %v3039_v36 }
 0x3be   : > { %2271 = vmatprep.subr.bf16.mxu0 %v3044_v37 }
 0x3c1   : > { %2272 = vmatpush1.bf16.msra.mxu0 %v3042_v38 }
 0x3c2   : > { %2273 = vmatprep.subr.bf16.mxu0 %v3047_v39 }
 0x3c5   : > { %2274 = vmatpush1.bf16.msra.mxu0 %v3045_v40 }
 0x3c6   : > { %2275 = vmatprep.subr.bf16.mxu0 %v3050_v41 }
 0x3c9   : > { %2276 = vmatpush1.bf16.msra.mxu0 %v3048_v43 }
 0x3ca   : > { %2277 = vmatprep.subr.bf16.mxu0 %v3053_v44 }
 0x3cd   : > { %2278 = vmatpush1.bf16.msra.mxu0 %v3051_v46 }
 0x3ce   : > { %2279 = vmatprep.subr.bf16.mxu0 %v3056_v47 }
 0x3d1   : > { %2280 = vmatpush1.bf16.msra.mxu0 %v3054_v48 }
 0x3d2   : > { %2281 = vmatprep.subr.bf16.mxu0 %v3059_v50 }
 0x3d5   : > { %2282 = vmatpush1.bf16.msra.mxu0 %v3057_v51 }
 0x3d6   : > { %2283 = vmatprep.subr.bf16.mxu0 %v3062_v53 }
 0x3d9   : > { %2284 = vmatpush1.bf16.msra.mxu0 %v3060_v54 }
 0x3da   : > { %2285 = vmatprep.subr.bf16.mxu0 %v3065_v55 }
 0x3dd   : > { %2286 = vmatpush1.bf16.msra.mxu0 %v3063_v56 }
 0x3de   : > { %2287 = vmatprep.subr.bf16.mxu0 %v3068_v2 }
 0x3e1   : > { %2288 = vmatpush1.bf16.msra.mxu0 %v3066_v3 }
 0x453   : > { %v1943_v57 = vpop.f32.mrb[36].mxu1 }
 0x454   : > { %v2878_v58 = vpop.f32.mrb[37].mxu1 }
 0x455   : > { %v1946_v59 = vpop.f32.mrb[38].mxu1 }
 0x456   : > { %v2879_v60 = vpop.f32.mrb[39].mxu1 }
 0x457   : > { %v1897_v61 = vpop.f32.mrb[28].mxu0 }
 0x458   : > { %v2872_v62 = vpop.f32.mrb[29].mxu0 }
 0x459   : > { %v1900_v63 = vpop.f32.mrb[30].mxu0 }
 0x45a   : > { %v2873_v0 = vpop.f32.mrb[31].mxu0 }
 0x473   : > { %v2035_v4 = vpop.f32.mrb[40].mxu1 }
 0x474   : > { %v2935_v5 = vpack.i.bf16 %v1943_v57, %v2035_v4  ;;  %v2890_v7 = vpop.f32.mrb[41].mxu1 }
 0x475   : > { %v2038_v8 = vpop.f32.mrb[42].mxu1 }
 0x476   : > { %2936 = vrot.lane.b32.xlu0 %v2935_v5, %s3152_s12  ;;  %v2891_v9 = vpop.f32.mrb[43].mxu1  ;;  %s3089_s12 = sshll.u32 %s3153_s10, 4  ;;  %s3090_s12 = int_to_ptr.vmem [resolvable:$false] %s3089_s12 }
 0x477   : > { %v1989_v10 = vpop.f32.mrb[32].mxu0  ;;  %s3091_s17 = scalar_lea.vmem %s3090_s12, 512  ;;  %p3092_p0 = scmp.lt.s32.totalorder %s3826_s22, %s3090_s12 }
 0x478   : > { %v2884_v11 = vpop.f32.mrb[33].mxu0  ;;  %p3093_p1 = scmp.lt.s32.totalorder %s3091_s17, %s3085_s23 }
 0x479   : > { %v1992_v12 = vpop.f32.mrb[34].mxu0 }
 0x47a   : > { %v2885_v13 = vpop.f32.mrb[35].mxu0  ;;  %p3094_p2 = por %p3093_p1, %p3092_p0 }
 0x47c   : > { %p3095_p3 = pnand %p3094_p2, %p3088_p13 }
 0x4e8   : > { %v2937_v14 = vpop.permute.xlu0 %2936 }
 0x4e9   : > { %v2939_v6 = vunpack.i.h.bf16 %v2937_v14  ;;  %v2938_v15 = vunpack.i.l.bf16 %v2937_v14 }
 0x4eb   : > { %v2049_v16 = vsel %vm1362_vm1, %v1897_v61, %v2939_v6  ;;  %v2050_v17 = vsel %vm1362_vm1, %v1989_v10, %v2938_v15 }
 0x4ec   : > { %v2051_v18 = vpack.c.bf16 %v2049_v16, %v2049_v16  ;;  %v2052_v52 = vpack.c.bf16 %v2050_v17, %v2050_v17 }
 0x4ee   : > { %2289 = vmatprep.mubr.bf16.mxu0 %v2052_v52 }
 0x4ef   : > { %2290 = vmatmul.mubr.bf16.vlgmr.msra.gmra.mrb[36].mxu0 %v2051_v18 }
 0x5c2   : > { %v2291_v22 = vpop.f32.mrb[36].mxu0 }
 0x5c3   : > { %v2292_v23 = vadd.f32 %v2291_v22, %v2090_v45  ;;  %v2293_v24 = vpop.f32.mrb[37].mxu0 }
 0x5c4   : > { %v2294_v1 = vadd.f32 %v2293_v24, %v2094_v21  ;;  %v2295_v25 = vpop.f32.mrb[38].mxu0 }
 0x5c5   : > { %2298 = vst [vmem:[%s313_s26] sm:$0xff] %v2292_v23  ;;  %v2296_v42 = vpop.f32.mrb[39].mxu0 }
 0x5c6   : > { %2299 = vst [vmem:[%s313_s26 + $0x8] sm:$0xff] %v2294_v1 }
 0x5c7   : > { %3098 = shalt.err (!%p3095_p3)
}
 0x5c8   : > { %s3099_s13 = scalar_lea.hbm %s3824_s21, 256  ;;  %s3103_s20 = scalar_lea.hbm %s3874_s8, 512 }
 0x5c9   : > { %p3100_p4 = scmp.ne.s32.totalorder %s3824_s21, %s3099_s13  ;;  %p3104_p9 = scmp.lt.u32.totalorder %s3824_s21, %s3874_s8 }
 0x5ca   : > { %p3105_p10 = scmp.lt.u32.totalorder %s3103_s20, %s3099_s13  ;;  %p3107_p12 = scmp.lt.u32.totalorder %s3099_s13, %s3824_s21 }
 0x5cb   : > { %p3101_p7 = pnand %p3100_p4, %p3237_p5 }
 0x5cc   : > { %p3106_p11 = por %p3105_p10, %p3104_p9 }
 0x5cd   : > { %p3102_p8 = pneg %p3101_p7 }
 0x5ce   : > { %p3108_p13 = por %p3107_p12, %p3106_p11 }
 0x5d0   : > { %p3109_p0 = pnand %p3108_p13, %p3102_p8 }
 0x5d2   : > { %3112 = shalt.err (!%p3109_p0)
}
 0x5d3   : > { %2892 = dma.vmem_to_hbm [thread:$0]  (%p3237_p5), %s3826_s22, 256, %s3824_s21, %s2301_s9  }
 0x5d4 PF: > { %p2898_p1 = scmp.ge.s32.totalorder %s3147_s30, 2  ;;  %s2327_s25 = sand.u32 1, %s3135_s27  }
 0x5d5   : > { %s2328_s23 = scalar_lea.sflag [#allocation3], %s2327_s25 }
 0x5d6   : > { %p2895_p2 = pnand %p2898_p1, %p3241_p6 }
 0x5d8   : > { %3130 = dma.done.wait (!%p2895_p2), %s2328_s23, 256  }
 0x5d9   : > { %3132 = vsyncadd (!%p2895_p2), %s2328_s23, 4294967040  ;;  %p18_p3 = scmp.ge.s32.totalorder %s3224_s11, 4   ;;  %s3877_s27 = smov %s3139_s28 }
 0x5da   : > { %s3878_s28 = smov %s3143_s29  ;;  %s3879_s29 = smov %s3235_s14 }
 0x5db   : > { %s3880_s30 = smov %s3224_s11  ;;  %20 = sbr.rel (!%p18_p3) target bundleno = 3 (0x3), region = 90 }
 0x5e2   :  { %2333 = vsyncpa [#allocation3], 1 }
 0x5e3   :  { %2335 = vsyncpa [#allocation3 + $0x1], 1 }

</bundles_post_ra>
